<compile_context>
chip_gen: v5e
topology: v5e:2x2
jax: 0.10.0
libtpu: 0.0.40
codegen_flags: <defaults>
</compile_context>

<pallas_src>
import functools

import jax
import jax.numpy as jnp
from jax.experimental import pallas as pl
from jax.experimental.pallas import tpu as pltpu


def _round_up(x, m):
    return (x + m - 1) // m * m


# ----------------------------------------------------------------------------
# One streamed pass:  out = epilogue(A_hat @ B + bias)
#   A_hat : [M_pad, K_pad] bf16   (row-tiled tm, col-tiled tk)
#   B     : [K_pad, C_pad] bf16   (already projected; C_pad multiple of 128)
#   bias  : [1, C_pad]     f32
# ----------------------------------------------------------------------------
def _gcn_pass_kernel(a_ref, b_ref, bias_ref, o_ref, acc_ref, *, epilogue, valid_cols):
    k = pl.program_id(1)

    @pl.when(k == 0)
    def _init():
        acc_ref[...] = jnp.zeros_like(acc_ref)

    # bf16 MXU matmul, f32 accumulation.
    acc_ref[...] += jnp.dot(a_ref[...], b_ref[...],
                            preferred_element_type=jnp.float32)

    @pl.when(k == pl.num_programs(1) - 1)
    def _epilogue():
        z = acc_ref[...] + bias_ref[...]                      # f32 epilogue
        if epilogue == "relu":
            o_ref[...] = jnp.maximum(z, 0.0)
        else:  # log_softmax over the valid (unpadded) feature columns
            col = jax.lax.broadcasted_iota(jnp.int32, z.shape, 1)
            z = jnp.where(col < valid_cols, z, -jnp.inf)      # mask padded lanes
            m = jnp.max(z, axis=1, keepdims=True)
            s = z - m
            lse = jnp.log(jnp.sum(jnp.exp(s), axis=1, keepdims=True))
            o_ref[...] = s - lse


def _a_stream_pass(a_bf16, b_bf16, bias_f32, *, epilogue, valid_cols, tm, tk):
    m_pad, k_pad = a_bf16.shape
    c_pad = b_bf16.shape[1]
    grid = (m_pad // tm, k_pad // tk)

    kernel = functools.partial(_gcn_pass_kernel,
                               epilogue=epilogue, valid_cols=valid_cols)

    cost = pl.CostEstimate(
        flops=2 * m_pad * k_pad * c_pad,
        transcendentals=(m_pad * c_pad) if epilogue == "log_softmax" else 0,
        bytes_accessed=a_bf16.size * 2 + b_bf16.size * 2 + m_pad * c_pad * 4,
    )

    return pl.pallas_call(
        kernel,
        out_shape=jax.ShapeDtypeStruct((m_pad, c_pad), jnp.float32),
        grid_spec=pltpu.PrefetchScalarGridSpec(
            num_scalar_prefetch=0,
            grid=grid,
            in_specs=[
                pl.BlockSpec((tm, tk), lambda i, k: (i, k)),        # A_hat tile
                pl.BlockSpec((tk, c_pad), lambda i, k: (k, 0)),     # projected features
                pl.BlockSpec((1, c_pad), lambda i, k: (0, 0)),      # bias (tiny, resident)
            ],
            out_specs=pl.BlockSpec((tm, c_pad), lambda i, k: (i, 0)),
            scratch_shapes=[pltpu.VMEM((tm, c_pad), jnp.float32)],  # f32 accumulator
        ),
        compiler_params=pltpu.CompilerParams(
            dimension_semantics=("parallel", "arbitrary")),
        cost_estimate=cost,
    )(a_bf16, b_bf16, bias_f32)


# ----------------------------------------------------------------------------
# Full forward: H = relu(A @ (X W1) + b1);  out = log_softmax(A @ (H W2) + b2)
# ----------------------------------------------------------------------------
def craph_cnn_forward(x, a_hat, w1, b1, w2, b2, *, tm_default=256, tk_default=512):
    n, in_c = x.shape
    hid_c = w1.shape[1]
    out_c = w2.shape[1]

    # Lane-dense feature widths.
    hid_pad = _round_up(hid_c, 128)
    out_pad = _round_up(out_c, 128)

    # Per-call tile sizes (clamped for small graphs; defaults sized so a bf16 A tile
    # is <= 256 KiB -> fits comfortably in every generation's scoped VMEM, incl. v7x).
    tm = min(tm_default, _round_up(n, 8))
    tk = min(tk_default, _round_up(n, 8))
    m_pad = _round_up(n, tm)
    k_pad = _round_up(n, tk)

    # A_hat streamed in bf16 (halves HBM traffic; f32 accumulation keeps accuracy).
    a_bf16 = jnp.zeros((m_pad, k_pad), jnp.bfloat16).at[:n, :n].set(
        a_hat.astype(jnp.bfloat16))

    # Pad parameters to lane-dense widths (zero columns -> zero activations -> masked later).
    w1p = jnp.zeros((in_c, hid_pad), jnp.float32).at[:, :hid_c].set(w1)
    b1p = jnp.zeros((1, hid_pad), jnp.float32).at[:, :hid_c].set(b1.reshape(1, -1))
    w2p = jnp.zeros((hid_c, out_pad), jnp.float32).at[:, :out_c].set(w2)
    b2p = jnp.zeros((1, out_pad), jnp.float32).at[:, :out_c].set(b2.reshape(1, -1))

    # Layer 1: projection hoisted out of the A loop, then stream A.
    xw1 = jnp.zeros((k_pad, hid_pad), jnp.float32).at[:n, :].set(x @ w1p)
    h_pad = _a_stream_pass(a_bf16, xw1.astype(jnp.bfloat16), b1p,
                           epilogue="relu", valid_cols=hid_pad, tm=tm, tk=tk)
    h = h_pad[:n, :hid_c]

    # Layer 2: projection hoisted, then stream A again with fused masked log_softmax.
    hw2 = jnp.zeros((k_pad, out_pad), jnp.float32).at[:n, :].set(h @ w2p)
    z_pad = _a_stream_pass(a_bf16, hw2.astype(jnp.bfloat16), b2p,
                           epilogue="log_softmax", valid_cols=out_c, tm=tm, tk=tk)
    return z_pad[:n, :out_c]


def normalized_adjacency(edge_index, num_nodes):
    """Dense D^{-1/2}(A+I)D^{-1/2} as used by PyG GCNConv (add_self_loops=True).
    Assumes edge_index is symmetric (undirected), matching PyG semantics."""
    src = edge_index[0]
    dst = edge_index[1]
    adj = jnp.zeros((num_nodes, num_nodes), jnp.float32)
    adj = adj.at[dst, src].add(1.0)                         # messages: source -> target
    adj = adj + jnp.eye(num_nodes, dtype=jnp.float32)       # self-loops
    deg = jnp.sum(adj, axis=1)
    dinv = jnp.where(deg > 0, 1.0 / jnp.sqrt(deg), 0.0)
    return dinv[:, None] * adj * dinv[None, :]


if __name__ == "__main__":
    # Small deterministic problem: N=8 nodes, in_c=4, hid_c=32, out_c=8
    N, IN_C, HID_C, OUT_C = 8, 4, 32, 8

    key = jax.random.PRNGKey(0)
    kx, kw1, kw2 = jax.random.split(key, 3)

    # Node features (data.x)
    x = jax.random.normal(kx, (N, IN_C), dtype=jnp.float32)

    # Undirected ring graph as edge_index [2, E]
    fwd = jnp.arange(N, dtype=jnp.int32)
    nxt = (fwd + 1) % N
    edge_index = jnp.stack(
        [jnp.concatenate([fwd, nxt]), jnp.concatenate([nxt, fwd])], axis=0
    )  # [2, 2N]

    a_hat = normalized_adjacency(edge_index, N)

    # Deterministic parameter init (GCNConv: glorot-style weight, zero bias)
    def glorot(k, shape):
        fan_in, fan_out = shape
        limit = jnp.sqrt(6.0 / (fan_in + fan_out))
        return jax.random.uniform(k, shape, jnp.float32, -limit, limit)

    w1 = glorot(kw1, (IN_C, HID_C))
    b1 = jnp.zeros((1, HID_C), jnp.float32)
    w2 = glorot(kw2, (HID_C, OUT_C))
    b2 = jnp.zeros((1, OUT_C), jnp.float32)

    out = craph_cnn_forward(x, a_hat, w1, b1, w2, b2)
    jax.block_until_ready(out)

    assert out.shape == (N, OUT_C)

    # Sanity: log_softmax rows should (approximately) exp-sum to 1.
    row_sums = jnp.sum(jnp.exp(out), axis=1)
    assert bool(jnp.all(jnp.abs(row_sums - 1.0) < 1e-2))

    print("KERNEL_OK")
</pallas_src>

<mosaic_0001>
module attributes {stable_mosaic.version = 11 : i64} {
  func.func @_gcn_pass_kernel(%arg0: i32, %arg1: i32, %arg2: memref<8x8xbf16, #tpu.memory_space<vmem>>, %arg3: memref<8x128xbf16, #tpu.memory_space<vmem>>, %arg4: memref<1x128xf32, #tpu.memory_space<vmem>>, %arg5: memref<8x128xf32, #tpu.memory_space<vmem>>, %arg6: memref<8x128xf32, #tpu.memory_space<vmem>>) attributes {dimension_semantics = [#tpu.dimension_semantics<parallel>, #tpu.dimension_semantics<arbitrary>], iteration_bounds = array<i64: 1, 1>, scalar_prefetch = 0 : i64, scratch_operands = 1 : i64, tpu.core_type = #tpu.core_type<tc>, window_params = [{transform_indices = @transform_0, window_bounds = array<i64: 8, 8>}, {transform_indices = @transform_1, window_bounds = array<i64: 8, 128>}, {pipeline_mode = #tpu.pipeline_mode<synchronous>, transform_indices = @transform_2, window_bounds = array<i64: 1, 128>}, {transform_indices = @transform_3, window_bounds = array<i64: 8, 128>}]} {
    %c0_i32 = arith.constant 0 : i32
    %0 = arith.cmpi eq, %arg1, %c0_i32 : i32
    %1 = arith.extui %0 : i1 to i32
    %c0_i32_0 = arith.constant 0 : i32
    %2 = arith.cmpi ne, %1, %c0_i32_0 : i32
    scf.if %2 {
      %cst_10 = arith.constant 0.000000e+00 : f32
      %12 = vector.broadcast %cst_10 : f32 to vector<8x128xf32>
      %c0_11 = arith.constant 0 : index
      %c0_12 = arith.constant 0 : index
      %13 = vector.load %arg6[%c0_11, %c0_12] : memref<8x128xf32, #tpu.memory_space<vmem>>, vector<8x128xf32>
      tpu.vector_store %arg6[%c0_11, %c0_12], %12 {strides = array<i32>} : memref<8x128xf32, #tpu.memory_space<vmem>>, vector<8x128xf32>,
    } else {
    }
    %c0 = arith.constant 0 : index
    %c0_1 = arith.constant 0 : index
    %3 = vector.load %arg6[%c0, %c0_1] : memref<8x128xf32, #tpu.memory_space<vmem>>, vector<8x128xf32>
    %c0_2 = arith.constant 0 : index
    %c0_3 = arith.constant 0 : index
    %4 = vector.load %arg2[%c0_2, %c0_3] : memref<8x8xbf16, #tpu.memory_space<vmem>>, vector<8x8xbf16>
    %c0_4 = arith.constant 0 : index
    %c0_5 = arith.constant 0 : index
    %5 = vector.load %arg3[%c0_4, %c0_5] : memref<8x128xbf16, #tpu.memory_space<vmem>>, vector<8x128xbf16>
    %cst = arith.constant dense<0.000000e+00> : vector<8x128xf32>
    %6 = tpu.matmul %4, %5, %cst {dimension_numbers = #tpu.dot_dimension_numbers<[1], [0], [0], [1], [0, 0, 1, 1], [], []>} : vector<8x8xbf16>, vector<8x128xbf16>, vector<8x128xf32> -> vector<8x128xf32>
    %7 = arith.addf %3, %6 : vector<8x128xf32>
    %c0_6 = arith.constant 0 : index
    %c0_7 = arith.constant 0 : index
    %8 = vector.load %arg6[%c0_6, %c0_7] : memref<8x128xf32, #tpu.memory_space<vmem>>, vector<8x128xf32>
    tpu.vector_store %arg6[%c0_6, %c0_7], %7 {strides = array<i32>} : memref<8x128xf32, #tpu.memory_space<vmem>>, vector<8x128xf32>,
    %c0_i32_8 = arith.constant 0 : i32
    %9 = arith.cmpi eq, %arg1, %c0_i32_8 : i32
    %10 = arith.extui %9 : i1 to i32
    %c0_i32_9 = arith.constant 0 : i32
    %11 = arith.cmpi ne, %10, %c0_i32_9 : i32
    scf.if %11 {
      %c0_10 = arith.constant 0 : index
      %c0_11 = arith.constant 0 : index
      %12 = vector.load %arg6[%c0_10, %c0_11] : memref<8x128xf32, #tpu.memory_space<vmem>>, vector<8x128xf32>
      %c0_12 = arith.constant 0 : index
      %c0_13 = arith.constant 0 : index
      %13 = vector.load %arg4[%c0_12, %c0_13] : memref<1x128xf32, #tpu.memory_space<vmem>>, vector<1x128xf32>
      %14 = vector.broadcast %13 : vector<1x128xf32> to vector<8x128xf32>
      %15 = arith.addf %12, %14 : vector<8x128xf32>
      %cst_14 = arith.constant 0.000000e+00 : f32
      %16 = vector.broadcast %cst_14 : f32 to vector<8x128xf32>
      %17 = arith.maximumf %15, %16 : vector<8x128xf32>
      %c0_15 = arith.constant 0 : index
      %c0_16 = arith.constant 0 : index
      %18 = vector.load %arg5[%c0_15, %c0_16] : memref<8x128xf32, #tpu.memory_space<vmem>>, vector<8x128xf32>
      tpu.vector_store %arg5[%c0_15, %c0_16], %17 {strides = array<i32>} : memref<8x128xf32, #tpu.memory_space<vmem>>, vector<8x128xf32>,
    } else {
    }
    return
  }
  func.func @transform_0(%arg0: i32, %arg1: i32) -> (i32, i32) {
    %c0_i32 = arith.constant 0 : i32
    return %arg0, %arg1 : i32, i32
  }
  func.func @transform_1(%arg0: i32, %arg1: i32) -> (i32, i32) {
    %c0_i32 = arith.constant 0 : i32
    %c0_i32_0 = arith.constant 0 : i32
    return %arg1, %c0_i32 : i32, i32
  }
  func.func @transform_2(%arg0: i32, %arg1: i32) -> (i32, i32) {
    %c0_i32 = arith.constant 0 : i32
    %c0_i32_0 = arith.constant 0 : i32
    %c0_i32_1 = arith.constant 0 : i32
    return %c0_i32, %c0_i32_0 : i32, i32
  }
  func.func @transform_3(%arg0: i32, %arg1: i32) -> (i32, i32) {
    %c0_i32 = arith.constant 0 : i32
    %c0_i32_0 = arith.constant 0 : i32
    return %arg0, %c0_i32 : i32, i32
  }
}

</mosaic_0001>

<bundles_post_ra>
// kernel: tpu_custom_call.1
= control target key start
LH: loop header
LB: loop body
LE: loop exit
PB: predicated region body
PF: predicated region fallthrough
CT: control target
= control target key end

     0   :  { %8 = vsyncpa [#allocation4], 0  ;;  %s222_s0 = inlined_call_operand.hbm [shape: bf16[8,8], index: 0, kind: input, shape index: {}]   ;;  %s223_s1 = inlined_call_operand.hbm [shape: bf16[8,128], index: 1, kind: input, shape index: {}]   ;;  %s224_s2 = inlined_call_operand.vmem [shape: f32[1,128], index: 2, kind: input, shape index: {}]   ;;  %s225_s3 = inlined_call_operand.hbm [shape: f32[8,128], index: 3, kind: output, shape index: {}]  }
   0x1   :  { %9 = vsyncpa [#allocation7], 0 }
   0x2   :  { %10 = vsyncpa [#allocation5], 0  ;;  %s16_s14 = sshll.u32 %s222_s0, 4  ;;  %s187_s15 = smov [#allocation3]   ;;  %s17_s14 = int_to_ptr.hbm [resolvable:$true] %s16_s14 }
   0x3   :  { %s18_s16 = sshll.u32 %s187_s15, 4  ;;  %s27_s19 = sshll.u32 %s223_s1, 4  ;;  %s19_s16 = int_to_ptr.vmem [resolvable:$true] %s18_s16  ;;  %s28_s19 = int_to_ptr.hbm [resolvable:$true] %s27_s19 }
   0x4   :  { %21 = dma.hbm_to_vmem [thread:$0]  %s17_s14, 64, %s19_s16, [#allocation4]  }
   0x5   :  { %s188_s20 = smov [#allocation6]  }
   0x6   :  { %s29_s21 = sshll.u32 %s188_s20, 4  ;;  %s30_s21 = int_to_ptr.vmem [resolvable:$true] %s29_s21 }
   0x7   :  { %32 = dma.hbm_to_vmem [thread:$0]  %s28_s19, 64, %s30_s21, [#allocation7]  }
   0x8   :  { %181 = dma.done.wait [#allocation4], 64  }
   0x9   :  { %182 = vsyncadd [#allocation4], 4294967232 }
   0xa   :  { %183 = dma.done.wait [#allocation7], 64  }
   0xb   :  { %184 = vsyncadd [#allocation7], 4294967232  ;;  %vm56_vm0 = vcmask 1043456   ;;  %v51_v0 = vld [vmem:[#allocation6] sm:$0xf]  ;;  %vm52_vm1 = vcmask 64512  }
   0xc   :  { %v58_v1 = vsel %vm56_vm0, %v51_v0, 0  ;;  %v50_v2 = vld [vmem:[#allocation3] sm:$0xf]  ;;  %s189_s1 = smov [#allocation8]   ;;  %s93_s26 = sshll.u32 %s225_s3, 4  ;;  %s94_s26 = int_to_ptr.hbm [resolvable:$true] %s93_s26 }
   0xd   :  { %67 = vmatpush.bf16.msra.mxu0 %v58_v1  ;;  %v108_v3 = vld [vmem:[%s224_s2] ss:$0 sm:$0xff]  ;;  %s91_s23 = sshll.u32 %s189_s1, 4  ;;  %s92_s23 = int_to_ptr.vmem [resolvable:$true] %s91_s23 }
  0x10   :  { %104 = vmatmul.msk.bf16.vlgmr.msra.gmra.mxu0 %vm52_vm1, %v50_v2 }
  0x8d   :  { %v69_v4 = vpop.f32.mrf.mxu0 }
  0x8e   :  { %v83_v5 = vadd.f32 %v108_v3, %v69_v4 }
  0x90   :  { %v84_v6 = vmax.f32 %v83_v5, 0.0 }
  0x92   :  { %85 = vst [vmem:[#allocation8] sm:$0xff] %v84_v6 }
  0x93   :  { %96 = dma.vmem_to_hbm [thread:$0]  %s92_s23, 128, %s94_s26, [#allocation5]  }
  0x95   :  { %v71_v7 = vpop.f32.mrf.mxu0 }
  0x96   :  { %185 = dma.done.wait [#allocation5], 128  }
  0x97   :  { %186 = vsyncadd [#allocation5], 4294967168 }
  0x98   :  { %101 = vsyncpa [#allocation4], 1 }
  0x99   :  { %102 = vsyncpa [#allocation7], 1 }
  0x9a   :  { %103 = vsyncpa [#allocation5], 1 }

</bundles_post_ra>
